<compile_context>
chip_gen: v5e
topology: v5e:2x2
jax: 0.10.0
libtpu: 0.0.40
codegen_flags: <defaults>
</compile_context>

<pallas_src>
import functools

import jax
import jax.numpy as jnp
from jax import lax
from jax.experimental import pallas as pl
from jax.experimental.pallas import tpu as pltpu


def _conv_gn_mish_kernel(x_ref, w_ref, gb_ref, *rest, n_batch, count, eps, general):
    # x_ref:    (N, Cin, HW)   whole batch, HW on lanes
    # w_ref:    (Cout, Cin)
    # gb_ref:   (2, Cout, 1)   gamma / beta stacked, broadcast along lanes
    # b_ref:    (Cout, 1)      only present when cpg > 1 (bias not cancelled by GN)
    # mask_ref: (Cout, Cout)   only present when cpg > 1 (group aggregation)
    if general:
        b_ref, mask_ref, o_ref = rest
    else:
        (o_ref,) = rest

    w = w_ref[...]
    gamma = gb_ref[0]                                          # (Cout, 1)
    beta = gb_ref[1]                                           # (Cout, 1)

    # Statically unrolled over the (tiny) batch: one invocation, no grid-step overhead.
    for n in range(n_batch):
        x = x_ref[n]                                           # (Cin, HW)

        # ---- 1x1 conv: (Cout, Cin) @ (Cin, HW) -> (Cout, HW) on the MXU ----
        y = jnp.dot(w, x, preferred_element_type=jnp.float32)
        if general:
            # cpg > 1: bias is NOT cancelled by the group mean -> apply it.
            y = y + b_ref[...]

        # ---- GroupNorm (centered two-pass; per-(sample, group) stats) ----
        s = jnp.sum(y, axis=1, keepdims=True)                  # (Cout, 1) per-channel sum
        if general:
            s = jnp.dot(mask_ref[...], s, preferred_element_type=jnp.float32)
        mean = s * (1.0 / count)
        d = y - mean                                           # reused for normalization
        sq = jnp.sum(d * d, axis=1, keepdims=True)             # (Cout, 1)
        if general:
            sq = jnp.dot(mask_ref[...], sq, preferred_element_type=jnp.float32)
        var = sq * (1.0 / count)

        # Fold the per-channel affine on the (Cout, 1) column before broadcasting.
        scale = lax.rsqrt(var + eps) * gamma                   # (Cout, 1)
        z = d * scale + beta                                   # one full-width mul-add

        # ---- Mish with one exponential ----
        # tanh(softplus(z)) = (e^2 + 2e) / (e^2 + 2e + 2),  e = exp(z)
        e = jnp.exp(jnp.minimum(z, 20.0))                      # clamp avoids e^2 overflow
        num = e * (e + 2.0)
        t = num * pl.reciprocal(num + 2.0, approx=False)       # exact recip; approx would
        t = jnp.where(z > 20.0, jnp.float32(1.0), t)           # brush the 1e-4 tolerance
        o_ref[n] = (z * t).astype(o_ref.dtype)


def conv2d_gn_mish(x_nchw, w, b, gamma, beta, *, num_groups=32, eps=1e-5):
    """x_nchw: (N, Cin, H, W); w: (Cout, Cin, 1, 1); b/gamma/beta: (Cout,). All f32."""
    N, Cin, H, W = x_nchw.shape
    Cout = w.shape[0]
    assert Cout % num_groups == 0
    cpg = Cout // num_groups
    HW = H * W

    # NCHW-native glue: pure reshapes, no transposes, no dtype casts.
    x = x_nchw.reshape(N, Cin, HW)
    wk = w.reshape(Cout, Cin)
    gb = jnp.stack([gamma.reshape(Cout, 1), beta.reshape(Cout, 1)], axis=0)  # (2, Cout, 1)

    general = cpg > 1  # shipped GroupNorm(32, 32) -> cpg == 1 -> bias & mask skipped
    operands = [x, wk, gb]
    in_specs = [
        pl.BlockSpec((N, Cin, HW), lambda i: (0, 0, 0)),
        pl.BlockSpec((Cout, Cin), lambda i: (0, 0)),
        pl.BlockSpec((2, Cout, 1), lambda i: (0, 0, 0)),
    ]
    if general:
        operands.append(b.reshape(Cout, 1).astype(jnp.float32))
        in_specs.append(pl.BlockSpec((Cout, 1), lambda i: (0, 0)))
        grp = jnp.arange(Cout) // cpg
        mask = (grp[:, None] == grp[None, :]).astype(jnp.float32)  # (Cout, Cout)
        operands.append(mask)
        in_specs.append(pl.BlockSpec((Cout, Cout), lambda i: (0, 0)))

    kernel = functools.partial(_conv_gn_mish_kernel,
                               n_batch=N, count=float(HW * cpg), eps=float(eps),
                               general=general)

    # Advisory cost hint so XLA overlaps this sub-microsecond call with neighbors.
    cost = pl.CostEstimate(
        flops=2 * N * Cout * Cin * HW + 12 * N * Cout * HW,
        transcendentals=N * Cout * HW,
        bytes_accessed=4 * (x.size + wk.size + gb.size + N * Cout * HW),
    )

    out = pl.pallas_call(
        kernel,
        out_shape=jax.ShapeDtypeStruct((N, Cout, HW), jnp.float32),
        grid_spec=pltpu.PrefetchScalarGridSpec(
            num_scalar_prefetch=0,
            grid=(1,),                       # single invocation: whole problem in one step
            in_specs=in_specs,
            out_specs=pl.BlockSpec((N, Cout, HW), lambda i: (0, 0, 0)),
        ),
        cost_estimate=cost,
    )(*operands)

    # Pure reshape back to NCHW.
    return out.reshape(N, Cout, H, W)


def _reference(x_nchw, w, b, gamma, beta, *, num_groups=32, eps=1e-5):
    """Pure-JAX reference matching PyTorch Conv2d(k=1)+GroupNorm+Mish."""
    N, Cin, H, W = x_nchw.shape
    Cout = w.shape[0]
    y = jnp.einsum("nchw,oc->nohw", x_nchw, w.reshape(Cout, Cin)) + b[None, :, None, None]
    yg = y.reshape(N, num_groups, Cout // num_groups, H, W)
    mean = yg.mean(axis=(2, 3, 4), keepdims=True)
    var = yg.var(axis=(2, 3, 4), keepdims=True)
    yn = ((yg - mean) / jnp.sqrt(var + eps)).reshape(N, Cout, H, W)
    z = yn * gamma[None, :, None, None] + beta[None, :, None, None]
    return z * jnp.tanh(jax.nn.softplus(z))


if __name__ == "__main__":
    # Module config: in_dims=4, out_dims=32 (GroupNorm(32, 32)), kernel_size=1, bias=True
    N, Cin, H, W = 2, 4, 16, 16
    Cout = 32

    key = jax.random.PRNGKey(0)
    kx, kw, kb, kg, kbe = jax.random.split(key, 5)
    x = jax.random.normal(kx, (N, Cin, H, W), dtype=jnp.float32)
    w = jax.random.normal(kw, (Cout, Cin, 1, 1), dtype=jnp.float32) * 0.1
    b = jax.random.normal(kb, (Cout,), dtype=jnp.float32) * 0.1
    gamma = 1.0 + 0.1 * jax.random.normal(kg, (Cout,), dtype=jnp.float32)
    beta = 0.1 * jax.random.normal(kbe, (Cout,), dtype=jnp.float32)

    out = conv2d_gn_mish(x, w, b, gamma, beta)
    jax.block_until_ready(out)

    ref = _reference(x, w, b, gamma, beta)
    assert out.shape == (N, Cout, H, W), out.shape
    assert jnp.allclose(out, ref, atol=1e-4, rtol=1e-4), float(jnp.max(jnp.abs(out - ref)))

    print("KERNEL_OK")
</pallas_src>

<mosaic_0001>
module attributes {stable_mosaic.version = 11 : i64} {
  func.func @_conv_gn_mish_kernel(%arg0: i32, %arg1: memref<2x4x256xf32, #tpu.memory_space<vmem>>, %arg2: memref<32x4xf32, #tpu.memory_space<vmem>>, %arg3: memref<2x32x1xf32, #tpu.memory_space<vmem>>, %arg4: memref<2x32x256xf32, #tpu.memory_space<vmem>>) attributes {dimension_semantics = [#tpu.dimension_semantics<arbitrary>], iteration_bounds = array<i64: 1>, scalar_prefetch = 0 : i64, scratch_operands = 0 : i64, tpu.core_type = #tpu.core_type<tc>, window_params = [{pipeline_mode = #tpu.pipeline_mode<synchronous>, transform_indices = @transform_0, window_bounds = array<i64: 2, 4, 256>}, {pipeline_mode = #tpu.pipeline_mode<synchronous>, transform_indices = @transform_1, window_bounds = array<i64: 32, 4>}, {pipeline_mode = #tpu.pipeline_mode<synchronous>, transform_indices = @transform_2, window_bounds = array<i64: 2, 32, 1>}, {pipeline_mode = #tpu.pipeline_mode<synchronous>, transform_indices = @transform_3, window_bounds = array<i64: 2, 32, 256>}]} {
    %c0 = arith.constant 0 : index
    %c0_0 = arith.constant 0 : index
    %0 = vector.load %arg2[%c0, %c0_0] : memref<32x4xf32, #tpu.memory_space<vmem>>, vector<32x4xf32>
    %c0_1 = arith.constant 0 : index
    %c0_2 = arith.constant 0 : index
    %c0_3 = arith.constant 0 : index
    %1 = vector.load %arg3[%c0_1, %c0_2, %c0_3] : memref<2x32x1xf32, #tpu.memory_space<vmem>>, vector<1x32x1xf32>
    %2 = vector.shape_cast %1 : vector<1x32x1xf32> to vector<32x1xf32>
    %c1 = arith.constant 1 : index
    %c0_4 = arith.constant 0 : index
    %c0_5 = arith.constant 0 : index
    %3 = vector.load %arg3[%c1, %c0_4, %c0_5] : memref<2x32x1xf32, #tpu.memory_space<vmem>>, vector<1x32x1xf32>
    %4 = vector.shape_cast %3 : vector<1x32x1xf32> to vector<32x1xf32>
    %c0_6 = arith.constant 0 : index
    %c0_7 = arith.constant 0 : index
    %c0_8 = arith.constant 0 : index
    %5 = vector.load %arg1[%c0_6, %c0_7, %c0_8] : memref<2x4x256xf32, #tpu.memory_space<vmem>>, vector<1x4x256xf32>
    %6 = vector.shape_cast %5 : vector<1x4x256xf32> to vector<4x256xf32>
    %cst = arith.constant dense<0.000000e+00> : vector<32x256xf32>
    %7 = tpu.matmul %0, %6, %cst {dimension_numbers = #tpu.dot_dimension_numbers<[1], [0], [0], [1], [0, 0, 1, 1], [], []>} : vector<32x4xf32>, vector<4x256xf32>, vector<32x256xf32> -> vector<32x256xf32>
    %cst_9 = arith.constant dense<0.000000e+00> : vector<32xf32>
    %8 = vector.multi_reduction <add>, %7, %cst_9 [1] : vector<32x256xf32> to vector<32xf32>
    %9 = vector.shape_cast %8 : vector<32xf32> to vector<32x1xf32>
    %cst_10 = arith.constant 3.906250e-03 : f32
    %10 = vector.broadcast %cst_10 : f32 to vector<32x1xf32>
    %11 = arith.mulf %9, %10 : vector<32x1xf32>
    %12 = vector.broadcast %11 : vector<32x1xf32> to vector<32x256xf32>
    %13 = arith.subf %7, %12 : vector<32x256xf32>
    %14 = arith.mulf %13, %13 : vector<32x256xf32>
    %cst_11 = arith.constant dense<0.000000e+00> : vector<32xf32>
    %15 = vector.multi_reduction <add>, %14, %cst_11 [1] : vector<32x256xf32> to vector<32xf32>
    %16 = vector.shape_cast %15 : vector<32xf32> to vector<32x1xf32>
    %cst_12 = arith.constant 3.906250e-03 : f32
    %17 = vector.broadcast %cst_12 : f32 to vector<32x1xf32>
    %18 = arith.mulf %16, %17 : vector<32x1xf32>
    %cst_13 = arith.constant 9.99999974E-6 : f32
    %19 = vector.broadcast %cst_13 : f32 to vector<32x1xf32>
    %20 = arith.addf %18, %19 : vector<32x1xf32>
    %21 = math.rsqrt %20 : vector<32x1xf32>
    %22 = arith.mulf %21, %2 : vector<32x1xf32>
    %23 = vector.broadcast %22 : vector<32x1xf32> to vector<32x256xf32>
    %24 = arith.mulf %13, %23 : vector<32x256xf32>
    %25 = vector.broadcast %4 : vector<32x1xf32> to vector<32x256xf32>
    %26 = arith.addf %24, %25 : vector<32x256xf32>
    %cst_14 = arith.constant 2.000000e+01 : f32
    %27 = vector.broadcast %cst_14 : f32 to vector<32x256xf32>
    %28 = arith.minimumf %26, %27 : vector<32x256xf32>
    %29 = math.exp %28 : vector<32x256xf32>
    %cst_15 = arith.constant 2.000000e+00 : f32
    %30 = vector.broadcast %cst_15 : f32 to vector<32x256xf32>
    %31 = arith.addf %29, %30 : vector<32x256xf32>
    %32 = arith.mulf %29, %31 : vector<32x256xf32>
    %cst_16 = arith.constant 2.000000e+00 : f32
    %33 = vector.broadcast %cst_16 : f32 to vector<32x256xf32>
    %34 = arith.addf %32, %33 : vector<32x256xf32>
    %35 = tpu.reciprocal %34 : vector<32x256xf32> -> vector<32x256xf32>
    %36 = arith.mulf %32, %35 : vector<32x256xf32>
    %cst_17 = arith.constant 2.000000e+01 : f32
    %37 = vector.broadcast %cst_17 : f32 to vector<32x256xf32>
    %38 = arith.cmpf ogt, %26, %37 : vector<32x256xf32>
    %cst_18 = arith.constant 1.000000e+00 : f32
    %39 = vector.broadcast %cst_18 : f32 to vector<32x256xf32>
    %40 = arith.select %38, %39, %36 : vector<32x256xi1>, vector<32x256xf32>
    %41 = arith.mulf %26, %40 : vector<32x256xf32>
    %c0_19 = arith.constant 0 : index
    %c0_20 = arith.constant 0 : index
    %c0_21 = arith.constant 0 : index
    %42 = vector.load %arg4[%c0_19, %c0_20, %c0_21] : memref<2x32x256xf32, #tpu.memory_space<vmem>>, vector<1x32x256xf32>
    %43 = vector.shape_cast %42 : vector<1x32x256xf32> to vector<32x256xf32>
    %44 = vector.shape_cast %41 : vector<32x256xf32> to vector<1x32x256xf32>
    tpu.vector_store %arg4[%c0_19, %c0_20, %c0_21], %44 {strides = array<i32>} : memref<2x32x256xf32, #tpu.memory_space<vmem>>, vector<1x32x256xf32>,
    %c1_22 = arith.constant 1 : index
    %c0_23 = arith.constant 0 : index
    %c0_24 = arith.constant 0 : index
    %45 = vector.load %arg1[%c1_22, %c0_23, %c0_24] : memref<2x4x256xf32, #tpu.memory_space<vmem>>, vector<1x4x256xf32>
    %46 = vector.shape_cast %45 : vector<1x4x256xf32> to vector<4x256xf32>
    %cst_25 = arith.constant dense<0.000000e+00> : vector<32x256xf32>
    %47 = tpu.matmul %0, %46, %cst_25 {dimension_numbers = #tpu.dot_dimension_numbers<[1], [0], [0], [1], [0, 0, 1, 1], [], []>} : vector<32x4xf32>, vector<4x256xf32>, vector<32x256xf32> -> vector<32x256xf32>
    %cst_26 = arith.constant dense<0.000000e+00> : vector<32xf32>
    %48 = vector.multi_reduction <add>, %47, %cst_26 [1] : vector<32x256xf32> to vector<32xf32>
    %49 = vector.shape_cast %48 : vector<32xf32> to vector<32x1xf32>
    %cst_27 = arith.constant 3.906250e-03 : f32
    %50 = vector.broadcast %cst_27 : f32 to vector<32x1xf32>
    %51 = arith.mulf %49, %50 : vector<32x1xf32>
    %52 = vector.broadcast %51 : vector<32x1xf32> to vector<32x256xf32>
    %53 = arith.subf %47, %52 : vector<32x256xf32>
    %54 = arith.mulf %53, %53 : vector<32x256xf32>
    %cst_28 = arith.constant dense<0.000000e+00> : vector<32xf32>
    %55 = vector.multi_reduction <add>, %54, %cst_28 [1] : vector<32x256xf32> to vector<32xf32>
    %56 = vector.shape_cast %55 : vector<32xf32> to vector<32x1xf32>
    %cst_29 = arith.constant 3.906250e-03 : f32
    %57 = vector.broadcast %cst_29 : f32 to vector<32x1xf32>
    %58 = arith.mulf %56, %57 : vector<32x1xf32>
    %cst_30 = arith.constant 9.99999974E-6 : f32
    %59 = vector.broadcast %cst_30 : f32 to vector<32x1xf32>
    %60 = arith.addf %58, %59 : vector<32x1xf32>
    %61 = math.rsqrt %60 : vector<32x1xf32>
    %62 = arith.mulf %61, %2 : vector<32x1xf32>
    %63 = vector.broadcast %62 : vector<32x1xf32> to vector<32x256xf32>
    %64 = arith.mulf %53, %63 : vector<32x256xf32>
    %65 = vector.broadcast %4 : vector<32x1xf32> to vector<32x256xf32>
    %66 = arith.addf %64, %65 : vector<32x256xf32>
    %cst_31 = arith.constant 2.000000e+01 : f32
    %67 = vector.broadcast %cst_31 : f32 to vector<32x256xf32>
    %68 = arith.minimumf %66, %67 : vector<32x256xf32>
    %69 = math.exp %68 : vector<32x256xf32>
    %cst_32 = arith.constant 2.000000e+00 : f32
    %70 = vector.broadcast %cst_32 : f32 to vector<32x256xf32>
    %71 = arith.addf %69, %70 : vector<32x256xf32>
    %72 = arith.mulf %69, %71 : vector<32x256xf32>
    %cst_33 = arith.constant 2.000000e+00 : f32
    %73 = vector.broadcast %cst_33 : f32 to vector<32x256xf32>
    %74 = arith.addf %72, %73 : vector<32x256xf32>
    %75 = tpu.reciprocal %74 : vector<32x256xf32> -> vector<32x256xf32>
    %76 = arith.mulf %72, %75 : vector<32x256xf32>
    %cst_34 = arith.constant 2.000000e+01 : f32
    %77 = vector.broadcast %cst_34 : f32 to vector<32x256xf32>
    %78 = arith.cmpf ogt, %66, %77 : vector<32x256xf32>
    %cst_35 = arith.constant 1.000000e+00 : f32
    %79 = vector.broadcast %cst_35 : f32 to vector<32x256xf32>
    %80 = arith.select %78, %79, %76 : vector<32x256xi1>, vector<32x256xf32>
    %81 = arith.mulf %66, %80 : vector<32x256xf32>
    %c1_36 = arith.constant 1 : index
    %c0_37 = arith.constant 0 : index
    %c0_38 = arith.constant 0 : index
    %82 = vector.load %arg4[%c1_36, %c0_37, %c0_38] : memref<2x32x256xf32, #tpu.memory_space<vmem>>, vector<1x32x256xf32>
    %83 = vector.shape_cast %82 : vector<1x32x256xf32> to vector<32x256xf32>
    %84 = vector.shape_cast %81 : vector<32x256xf32> to vector<1x32x256xf32>
    tpu.vector_store %arg4[%c1_36, %c0_37, %c0_38], %84 {strides = array<i32>} : memref<2x32x256xf32, #tpu.memory_space<vmem>>, vector<1x32x256xf32>,
    return
  }
  func.func @transform_0(%arg0: i32) -> (i32, i32, i32) {
    %c0_i32 = arith.constant 0 : i32
    %c0_i32_0 = arith.constant 0 : i32
    %c0_i32_1 = arith.constant 0 : i32
    %c0_i32_2 = arith.constant 0 : i32
    return %c0_i32, %c0_i32_0, %c0_i32_1 : i32, i32, i32
  }
  func.func @transform_1(%arg0: i32) -> (i32, i32) {
    %c0_i32 = arith.constant 0 : i32
    %c0_i32_0 = arith.constant 0 : i32
    %c0_i32_1 = arith.constant 0 : i32
    return %c0_i32, %c0_i32_0 : i32, i32
  }
  func.func @transform_2(%arg0: i32) -> (i32, i32, i32) {
    %c0_i32 = arith.constant 0 : i32
    %c0_i32_0 = arith.constant 0 : i32
    %c0_i32_1 = arith.constant 0 : i32
    %c0_i32_2 = arith.constant 0 : i32
    return %c0_i32, %c0_i32_0, %c0_i32_1 : i32, i32, i32
  }
  func.func @transform_3(%arg0: i32) -> (i32, i32, i32) {
    %c0_i32 = arith.constant 0 : i32
    %c0_i32_0 = arith.constant 0 : i32
    %c0_i32_1 = arith.constant 0 : i32
    %c0_i32_2 = arith.constant 0 : i32
    return %c0_i32, %c0_i32_0, %c0_i32_1 : i32, i32, i32
  }
}

</mosaic_0001>

<bundles_post_ra>
// kernel: tpu_custom_call.1
= control target key start
LH: loop header
LB: loop body
LE: loop exit
PB: predicated region body
PF: predicated region fallthrough
CT: control target
= control target key end

     0   :  { %s1592_s0 = inlined_call_operand.vmem [shape: f32[2,4,256], index: 0, kind: input, shape index: {}]   ;;  %s1593_s1 = inlined_call_operand.vmem [shape: f32[32,4], index: 1, kind: input, shape index: {}]   ;;  %s1594_s2 = inlined_call_operand.vmem [shape: f32[2,32,1], index: 2, kind: input, shape index: {}]   ;;  %s1595_s3 = inlined_call_operand.hbm [shape: f32[2,32,256], index: 3, kind: output, shape index: {}]  }
   0x1   :  { %v28_v0 = vld [vmem:[%s1592_s0] sm:$0xff] }
   0x2   :  { %30 = vst [vmem:[#allocation1] ss:$2 sm:$0xff] %v28_v0 }
   0x3   :  { %8 = vsyncpa [#allocation3], 0  ;;  %vm46_vm0 = vcmask 1043456   ;;  %v894_v1 = vld [vmem:[%s1592_s0 + $0x8] sm:$0xff]  ;;  %v15_v2 = vld [vmem:[%s1593_s1] sm:$0xff]  ;;  %vm33_vm1 = vcmask 31744  }
   0x4   :  { %v16_v5 = vld [vmem:[%s1593_s1 + $0x8] sm:$0xff]  ;;  %v17_v8 = vld [vmem:[%s1593_s1 + $0x10] sm:$0xff]  ;;  %v18_v9 = vld [vmem:[%s1593_s1 + $0x18] sm:$0xff]  ;;  %s868_s14 = sshll.u32 %s1595_s3, 4  ;;  %s1020_s15 = smov 256   ;;  %s869_s14 = int_to_ptr.hbm [resolvable:$true] %s868_s14 }
   0x5   :  { %s1021_s16 = smov 16  }
   0x9   :  { %v31_v3 = vld.sshfl [vmem:[#allocation1] sm:$0xff pattern:$0x75316420]  ;;  %v32_v4 = vld.sshfl [vmem:[#allocation1 + $0x8] sm:$0xff pattern:$0x75316420] }
   0xa   :  { %884 = vmatpush.msk.msra.mxu0 %vm46_vm0, %v31_v3  ;;  %889 = vmatpush.msk.msra.mxu1 %vm46_vm0, %v32_v4  ;;  %464 = vst [vmem:[#allocation1] ss:$2 sm:$0xff] %v894_v1 }
   0xb   :  { %885 = vmatmul.msk.f32.vlgmr.msra.gmra.mxu0 %vm33_vm1, %v15_v2  ;;  %890 = vmatmul.msk.f32.vlgmr.msra.gmra.mxu1 %vm33_vm1, %v15_v2 }
  0x11   :  { %v465_v6 = vld.sshfl [vmem:[#allocation1] sm:$0xff pattern:$0x75316420]  ;;  %v466_v7 = vld.sshfl [vmem:[#allocation1 + $0x8] sm:$0xff pattern:$0x75316420] }
  0x12   :  { %895 = vmatpush.msk.msra.mxu2 %vm46_vm0, %v465_v6  ;;  %900 = vmatpush.msk.msra.mxu3 %vm46_vm0, %v466_v7 }
  0x13   :  { %886 = vmatmul.msk.f32.gmra.mxu0 %vm33_vm1, %v16_v5  ;;  %891 = vmatmul.msk.f32.gmra.mxu1 %vm33_vm1, %v16_v5 }
  0x14   :  { %896 = vmatmul.msk.f32.vlgmr.msra.gmra.mxu2 %vm33_vm1, %v15_v2  ;;  %901 = vmatmul.msk.f32.vlgmr.msra.gmra.mxu3 %vm33_vm1, %v15_v2 }
  0x1b   :  { %887 = vmatmul.msk.f32.gmra.mxu0 %vm33_vm1, %v17_v8  ;;  %892 = vmatmul.msk.f32.gmra.mxu1 %vm33_vm1, %v17_v8 }
  0x1c   :  { %897 = vmatmul.msk.f32.gmra.mxu2 %vm33_vm1, %v16_v5  ;;  %902 = vmatmul.msk.f32.gmra.mxu3 %vm33_vm1, %v16_v5 }
  0x23   :  { %888 = vmatmul.msk.f32.gmra.mxu0 %vm33_vm1, %v18_v9  ;;  %893 = vmatmul.msk.f32.gmra.mxu1 %vm33_vm1, %v18_v9 }
  0x24   :  { %898 = vmatmul.msk.f32.gmra.mxu2 %vm33_vm1, %v17_v8  ;;  %903 = vmatmul.msk.f32.gmra.mxu3 %vm33_vm1, %v17_v8 }
  0x2c   :  { %899 = vmatmul.msk.f32.gmra.mxu2 %vm33_vm1, %v18_v9  ;;  %904 = vmatmul.msk.f32.gmra.mxu3 %vm33_vm1, %v18_v9 }
  0x88   :  { %v68_v10 = vpop.f32.mrf.mxu0  ;;  %v97_v11 = vpop.f32.mrf.mxu1 }
  0x89   :  { %v109_v12 = vadd.f32 %v97_v11, %v68_v10 }
  0x8b   :  { %110 = vadd.xlane.f32.xlu0 %v109_v12 }
  0x90   :  { %v71_v13 = vpop.f32.mrf.mxu0  ;;  %v100_v14 = vpop.f32.mrf.mxu1 }
  0x91   :  { %v112_v15 = vadd.f32 %v100_v14, %v71_v13 }
  0x93   :  { %113 = vadd.xlane.f32.xlu0 %v112_v15 }
  0x97   :  { %v488_v16 = vpop.f32.mrf.mxu2  ;;  %v517_v17 = vpop.f32.mrf.mxu3 }
  0x98   :  { %v74_v18 = vpop.f32.mrf.mxu0  ;;  %v103_v19 = vpop.f32.mrf.mxu1  ;;  %v529_v20 = vadd.f32 %v517_v17, %v488_v16 }
  0x99   :  { %v115_v21 = vadd.f32 %v103_v19, %v74_v18 }
  0x9a   :  { %530 = vadd.xlane.f32.xlu2 %v529_v20 }
  0x9b   :  { %116 = vadd.xlane.f32.xlu1 %v115_v21 }
  0x9f   :  { %v491_v22 = vpop.f32.mrf.mxu2  ;;  %v520_v23 = vpop.f32.mrf.mxu3 }
  0xa0   :  { %v77_v24 = vpop.f32.mrf.mxu0  ;;  %v106_v25 = vpop.f32.mrf.mxu1  ;;  %v532_v26 = vadd.f32 %v520_v23, %v491_v22 }
  0xa1   :  { %v118_v27 = vadd.f32 %v106_v25, %v77_v24 }
  0xa2   :  { %533 = vadd.xlane.f32.xlu2 %v532_v26  ;;  %v1018_v26 = vmov 0  }
  0xa3   :  { %119 = vadd.xlane.f32.xlu1 %v118_v27  ;;  %v880_v27 = vld [vmem:[%s1594_s2 + $0x20] sm:$0xff]  ;;  %910 = vset.pattern.permute.xlu2 %v1018_v26 }
  0xa4   :  { %909 = vset.pattern.permute.xlu1 %v1018_v26  ;;  %911 = vset.pattern.permute.xlu0 %v1018_v26 }
  0xa7   :  { %v494_v28 = vpop.f32.mrf.mxu2  ;;  %v523_v29 = vpop.f32.mrf.mxu3 }
  0xa8   :  { %v535_v30 = vadd.f32 %v523_v29, %v494_v28 }
  0xaa   :  { %536 = vadd.xlane.f32.xlu0 %v535_v30 }
  0xaf   :  { %v497_v31 = vpop.f32.mrf.mxu2  ;;  %v526_v32 = vpop.f32.mrf.mxu3 }
  0xb0   :  { %v538_v33 = vadd.f32 %v526_v32, %v497_v31 }
  0xb2   :  { %539 = vadd.xlane.f32.xlu1 %v538_v33 }
  0xfe   :  { %v111_v34 = vpop.xlane.xlu0 %110 }
  0xff   :  { %v121_v35 = vmul.f32 0.00390625, %v111_v34 }
 0x101   :  { %v1076_v36 = vsub.f32 %v68_v10, %v121_v35  ;;  %v1078_v37 = vsub.f32 %v97_v11, %v121_v35 }
 0x103   :  { %v133_v38 = vmul.f32 %v1076_v36, %v1076_v36  ;;  %v134_v39 = vmul.f32 %v1078_v37, %v1078_v37 }
 0x105   :  { %v141_v40 = vadd.f32 %v134_v39, %v133_v38 }
 0x106   :  { %v114_v41 = vpop.xlane.xlu0 %113 }
 0x107   :  { %v122_v42 = vmul.f32 0.00390625, %v114_v41  ;;  %142 = vadd.xlane.f32.xlu2 %v141_v40 }
 0x109   :  { %v1084_v43 = vsub.f32 %v71_v13, %v122_v42  ;;  %v1086_v44 = vsub.f32 %v100_v14, %v122_v42 }
 0x10b   :  { %v135_v45 = vmul.f32 %v1084_v43, %v1084_v43  ;;  %v136_v46 = vmul.f32 %v1086_v44, %v1086_v44 }
 0x10d   :  { %v531_v47 = vpop.xlane.xlu2 %530  ;;  %v144_v48 = vadd.f32 %v136_v46, %v135_v45 }
 0x10e   :  { %v541_v49 = vmul.f32 0.00390625, %v531_v47  ;;  %v117_v50 = vpop.xlane.xlu1 %116 }
 0x10f   :  { %v123_v51 = vmul.f32 0.00390625, %v117_v50  ;;  %145 = vadd.xlane.f32.xlu0 %v144_v48 }
 0x110   :  { %v1092_v52 = vsub.f32 %v488_v16, %v541_v49  ;;  %v1094_v53 = vsub.f32 %v517_v17, %v541_v49 }
 0x111   :  { %v1096_v54 = vsub.f32 %v74_v18, %v123_v51  ;;  %v1098_v55 = vsub.f32 %v103_v19, %v123_v51  ;;  %v19_v51 = vld [vmem:[%s1594_s2] sm:$0xff] }
 0x112   :  { %v553_v56 = vmul.f32 %v1092_v52, %v1092_v52  ;;  %v554_v57 = vmul.f32 %v1094_v53, %v1094_v53 }
 0x113   :  { %v137_v58 = vmul.f32 %v1096_v54, %v1096_v54  ;;  %v138_v59 = vmul.f32 %v1098_v55, %v1098_v55 }
 0x114   :  { %v561_v61 = vadd.f32 %v554_v57, %v553_v56 }
 0x115   :  { %v534_v60 = vpop.xlane.xlu2 %533  ;;  %v147_v62 = vadd.f32 %v138_v59, %v137_v58 }
 0x116   :  { %v542_v63 = vmul.f32 0.00390625, %v534_v60  ;;  %v120_v0 = vpop.xlane.xlu1 %119 }
 0x117   :  { %v124_v1 = vmul.f32 0.00390625, %v120_v0  ;;  %562 = vadd.xlane.f32.xlu0 %v561_v61  ;;  %148 = vadd.xlane.f32.xlu1 %v147_v62 }
 0x118   :  { %v1108_v2 = vsub.f32 %v491_v22, %v542_v63  ;;  %v1110_v3 = vsub.f32 %v520_v23, %v542_v63 }
 0x119   :  { %v1112_v4 = vsub.f32 %v77_v24, %v124_v1  ;;  %v1114_v5 = vsub.f32 %v106_v25, %v124_v1 }
 0x11a   :  { %v555_v6 = vmul.f32 %v1108_v2, %v1108_v2  ;;  %v556_v7 = vmul.f32 %v1110_v3, %v1110_v3 }
 0x11b   :  { %v139_v8 = vmul.f32 %v1112_v4, %v1112_v4  ;;  %v140_v9 = vmul.f32 %v1114_v5, %v1114_v5 }
 0x11c   :  { %v564_v11 = vadd.f32 %v556_v7, %v555_v6 }
 0x11d   :  { %v537_v10 = vpop.xlane.xlu0 %536  ;;  %v150_v12 = vadd.f32 %v140_v9, %v139_v8 }
 0x11e   :  { %v543_v13 = vmul.f32 0.00390625, %v537_v10 }
 0x11f   :  { %565 = vadd.xlane.f32.xlu1 %v564_v11  ;;  %151 = vadd.xlane.f32.xlu2 %v150_v12  ;;  %v20_v11 = vld [vmem:[%s1594_s2 + $0x8] sm:$0xff] }
 0x120   :  { %v1124_v14 = vsub.f32 %v494_v28, %v543_v13  ;;  %v1126_v15 = vsub.f32 %v523_v29, %v543_v13 }
 0x122   :  { %v557_v16 = vmul.f32 %v1124_v14, %v1124_v14  ;;  %v558_v17 = vmul.f32 %v1126_v15, %v1126_v15 }
 0x124   :  { %v567_v19 = vadd.f32 %v558_v17, %v557_v16 }
 0x125   :  { %v540_v18 = vpop.xlane.xlu1 %539 }
 0x126   :  { %v544_v20 = vmul.f32 0.00390625, %v540_v18 }
 0x127   :  { %568 = vadd.xlane.f32.xlu2 %v567_v19 }
 0x128   :  { %v1132_v21 = vsub.f32 %v497_v31, %v544_v20  ;;  %v1134_v22 = vsub.f32 %v526_v32, %v544_v20 }
 0x12a   :  { %v559_v23 = vmul.f32 %v1132_v21, %v1132_v21  ;;  %v560_v24 = vmul.f32 %v1134_v22, %v1134_v22 }
 0x12c   :  { %v570_v25 = vadd.f32 %v560_v24, %v559_v23 }
 0x12e   :  { %571 = vadd.xlane.f32.xlu0 %v570_v25 }
 0x138   :  { %235 = vperm.xlu1 %909, %v880_v27  }
 0x17a   :  { %v143_v28 = vpop.xlane.xlu2 %142 }
 0x17b   :  { %v153_v29 = vmul.f32 0.00390625, %v143_v28 }
 0x17d   :  { %v157_v30 = vadd.f32 1e-05, %v153_v29 }
 0x17f   :  { %912 = vrsqrt.f32 %v157_v30  ;;  %vm167_vm3 = vweird.f32 %v157_v30 }
 0x182   :  { %v146_v31 = vpop.xlane.xlu0 %145 }
 0x183   :  { %v154_v32 = vmul.f32 0.00390625, %v146_v31 }
 0x185   :  { %v913_v33 = vpop.eup %912  ;;  %v158_v34 = vadd.f32 1e-05, %v154_v32 }
 0x186   :  { %v162_v35 = vmul.f32 %v913_v33, %v157_v30  ;;  %vm168_vm2 = vweird.f32 %v913_v33 }
 0x187   :  { %914 = vrsqrt.f32 %v158_v34  ;;  %vm169_vm4 = vmor %vm167_vm3, %vm168_vm2  ;;  %vm177_vm6 = vweird.f32 %v158_v34 }
 0x188   :  { %v163_v38 = vmul.f32 %v913_v33, %v162_v35 }
 0x18a   :  { %v164_v39 = vmul.f32 0.5, %v163_v38  ;;  %v563_v40 = vpop.xlane.xlu0 %562  ;;  %v149_v41 = vpop.xlane.xlu1 %148  ;;  %v21_v38 = vld [vmem:[%s1594_s2 + $0x10] sm:$0xff] }
 0x18b   :  { %v573_v42 = vmul.f32 0.00390625, %v563_v40  ;;  %v155_v45 = vmul.f32 0.00390625, %v149_v41 }
 0x18c   :  { %v165_v46 = vsub.f32 1.5, %v164_v39 }
 0x18d   :  { %v915_v47 = vpop.eup %914  ;;  %v577_v48 = vadd.f32 1e-05, %v573_v42  ;;  %v159_v49 = vadd.f32 1e-05, %v155_v45 }
 0x18e   :  { %v172_v50 = vmul.f32 %v915_v47, %v158_v34  ;;  %v166_v56 = vmul.f32 %v913_v33, %v165_v46  ;;  %vm178_vm5 = vweird.f32 %v915_v47 }
 0x18f   :  { %916 = vrsqrt.f32 %v577_v48  ;;  %vm179_vm7 = vmor %vm177_vm6, %vm178_vm5  ;;  %vm587_vm9 = vweird.f32 %v577_v48  ;;  %vm187_vm12 = vweird.f32 %v159_v49 }
 0x190   :  { %v173_v57 = vmul.f32 %v915_v47, %v172_v50  ;;  %918 = vrsqrt.f32 %v159_v49  ;;  %v170_v58 = vsel %vm169_vm4, %v913_v33, %v166_v56 }
 0x191   :  { %v201_v59 = vmul.f32 %v170_v58, %v19_v51 }
 0x192   :  { %v174_v60 = vmul.f32 0.5, %v173_v57  ;;  %v152_v61 = vpop.xlane.xlu2 %151  ;;  %v566_v62 = vpop.xlane.xlu1 %565 }
 0x193   :  { %v156_v63 = vmul.f32 0.00390625, %v152_v61  ;;  %v574_v0 = vmul.f32 0.00390625, %v566_v62  ;;  %207 = vperm.xlu1 %909, %v201_v59  }
 0x194   :  { %v175_v1 = vsub.f32 1.5, %v174_v60 }
 0x195   :  { %v917_v6 = vpop.eup %916  ;;  %v1146_v7 = vadd.f32 1e-05, %v156_v63  ;;  %v578_v8 = vadd.f32 1e-05, %v574_v0  ;;  %v881_v63 = vld [vmem:[%s1594_s2 + $0x28] sm:$0xff] }
 0x196   :  { %v919_v9 = vpop.eup %918  ;;  %v582_v10 = vmul.f32 %v917_v6, %v577_v48  ;;  %v176_v12 = vmul.f32 %v915_v47, %v175_v1  ;;  %vm588_vm8 = vweird.f32 %v917_v6 }
 0x197   :  { %v182_v13 = vmul.f32 %v919_v9, %v159_v49  ;;  %920 = vrsqrt.f32 %v1146_v7  ;;  %vm188_vm10 = vweird.f32 %v919_v9  ;;  %vm589_vm11 = vmor %vm587_vm9, %vm588_vm8  ;;  %vm597_vm15 = vweird.f32 %v578_v8 }
 0x198   :  { %v583_v16 = vmul.f32 %v917_v6, %v582_v10  ;;  %922 = vrsqrt.f32 %v578_v8  ;;  %v180_v17 = vsel %vm179_vm7, %v915_v47, %v176_v12  ;;  %vm189_vm13 = vmor %vm187_vm12, %vm188_vm10  ;;  %vm197_vm3 = vweird.f32 %v1146_v7 }
 0x199   :  { %v183_v18 = vmul.f32 %v919_v9, %v182_v13  ;;  %v202_v19 = vmul.f32 %v180_v17, %v20_v11  ;;  %v22_v13 = vld [vmem:[%s1594_s2 + $0x18] sm:$0xff] }
 0x19a   :  { %v584_v20 = vmul.f32 0.5, %v583_v16  ;;  %v569_v23 = vpop.xlane.xlu2 %568 }
 0x19b   :  { %v184_v24 = vmul.f32 0.5, %v183_v18  ;;  %v575_v25 = vmul.f32 0.00390625, %v569_v23  ;;  %212 = vperm.xlu2 %910, %v202_v19  }
 0x19c   :  { %v585_v26 = vsub.f32 1.5, %v584_v20 }
 0x19d   :  { %v921_v27 = vpop.eup %920  ;;  %v185_v28 = vsub.f32 1.5, %v184_v24  ;;  %v579_v29 = vadd.f32 1e-05, %v575_v25  ;;  %v883_v24 = vld [vmem:[%s1594_s2 + $0x38] sm:$0xff] }
 0x19e   :  { %v923_v30 = vpop.eup %922  ;;  %v192_v31 = vmul.f32 %v921_v27, %v1146_v7  ;;  %v586_v32 = vmul.f32 %v917_v6, %v585_v26  ;;  %vm198_vm1 = vweird.f32 %v921_v27  ;;  %v882_v26 = vld [vmem:[%s1594_s2 + $0x30] sm:$0xff]  ;;  %s1019_s2 = smov [#allocation2]  }
 0x19f   :  { %v592_v33 = vmul.f32 %v923_v30, %v578_v8  ;;  %924 = vrsqrt.f32 %v579_v29  ;;  %v186_v39 = vmul.f32 %v919_v9, %v185_v28  ;;  %vm598_vm14 = vweird.f32 %v923_v30  ;;  %vm199_vm4 = vmor %vm197_vm3, %vm198_vm1  ;;  %s866_s11 = sshll.u32 %s1019_s2, 4  ;;  %s867_s11 = int_to_ptr.vmem [resolvable:$true] %s866_s11 }
 0x1a0   :  { %v193_v34 = vmul.f32 %v921_v27, %v192_v31  ;;  %v590_v35 = vsel %vm589_vm11, %v917_v6, %v586_v32  ;;  %vm599_vm0 = vmor %vm597_vm15, %vm598_vm14  ;;  %vm607_vm5 = vweird.f32 %v579_v29 }
 0x1a1   :  { %v593_v40 = vmul.f32 %v923_v30, %v592_v33  ;;  %v572_v41 = vpop.xlane.xlu0 %571  ;;  %v621_v42 = vmul.f32 %v590_v35, %v19_v51  ;;  %v190_v46 = vsel %vm189_vm13, %v919_v9, %v186_v39 }
 0x1a2   :  { %v576_v45 = vmul.f32 0.00390625, %v572_v41  ;;  %v194_v47 = vmul.f32 0.5, %v193_v34  ;;  %v203_v50 = vmul.f32 %v190_v46, %v21_v38 }
 0x1a3   :  { %v594_v48 = vmul.f32 0.5, %v593_v40  ;;  %627 = vperm.xlu1 %909, %v621_v42  }
 0x1a4   :  { %v580_v56 = vadd.f32 1e-05, %v576_v45  ;;  %217 = vperm.xlu0 %911, %v203_v50   ;;  %v195_v59 = vsub.f32 1.5, %v194_v47 }
 0x1a5   :  { %v925_v57 = vpop.eup %924  ;;  %v595_v49 = vsub.f32 1.5, %v594_v48 }
 0x1a6   :  { %v602_v58 = vmul.f32 %v925_v57, %v579_v29  ;;  %926 = vrsqrt.f32 %v580_v56  ;;  %v196_v1 = vmul.f32 %v921_v27, %v195_v59  ;;  %vm608_vm2 = vweird.f32 %v925_v57 }
 0x1a7   :  { %v596_v60 = vmul.f32 %v923_v30, %v595_v49  ;;  %vm609_vm6 = vmor %vm607_vm5, %vm608_vm2  ;;  %vm617_vm8 = vweird.f32 %v580_v56 }
 0x1a8   :  { %v603_v61 = vmul.f32 %v925_v57, %v602_v58 }
 0x1a9   :  { %v600_v62 = vsel %vm599_vm0, %v923_v30, %v596_v60 }
 0x1aa   :  { %v604_v51 = vmul.f32 0.5, %v603_v61  ;;  %v622_v0 = vmul.f32 %v600_v62, %v20_v11  ;;  %v200_v11 = vsel %vm199_vm4, %v921_v27, %v196_v1  ;;  %v236_v27 = vpop.permute.xlu1 %235 }
 0x1ab   :  { %v204_v19 = vmul.f32 %v200_v11, %v22_v13 }
 0x1ac   :  { %v927_v6 = vpop.eup %926  ;;  %v605_v9 = vsub.f32 1.5, %v604_v51  ;;  %632 = vperm.xlu2 %910, %v622_v0   ;;  %240 = vperm.xlu0 %911, %v881_v63  }
 0x1ad   :  { %v612_v10 = vmul.f32 %v927_v6, %v580_v56  ;;  %vm618_vm7 = vweird.f32 %v927_v6 }
 0x1ae   :  { %v606_v8 = vmul.f32 %v925_v57, %v605_v9  ;;  %vm619_vm9 = vmor %vm617_vm8, %vm618_vm7 }
 0x1af   :  { %v613_v12 = vmul.f32 %v927_v6, %v612_v10 }
 0x1b0   :  { %v610_v16 = vsel %vm609_vm6, %v925_v57, %v606_v8 }
 0x1b1   :  { %v614_v17 = vmul.f32 0.5, %v613_v12  ;;  %v623_v18 = vmul.f32 %v610_v16, %v21_v38 }
 0x1b3   :  { %v615_v20 = vsub.f32 1.5, %v614_v17  ;;  %637 = vperm.xlu1 %909, %v623_v18  }
 0x1b4   :  { %222 = vperm.xlu2 %910, %v204_v19  }
 0x1b5   :  { %v616_v7 = vmul.f32 %v927_v6, %v615_v20 }
 0x1b7   :  { %v620_v23 = vsel %vm619_vm9, %v927_v6, %v616_v7 }
 0x1b8   :  { %v624_v25 = vmul.f32 %v620_v23, %v22_v13 }
 0x1bb   :  { %250 = vperm.xlu1 %909, %v883_v24  }
 0x1bc   :  { %642 = vperm.xlu2 %910, %v624_v25  }
 0x1c4   :  { %245 = vperm.xlu2 %910, %v882_v26  }
 0x1f5   :  { %v213_v28 = vpop.permute.xlu2 %212 }
 0x205   :  { %v208_v29 = vpop.permute.xlu1 %207 }
 0x206   :  { %v633_v30 = vpop.permute.xlu2 %632  ;;  %v225_v31 = vmul.f32 %v208_v29, %v1076_v36  ;;  %v226_v32 = vmul.f32 %v208_v29, %v1078_v37 }
 0x207   :  { %v647_v6 = vmul.f32 %v633_v30, %v1108_v2  ;;  %v648_v9 = vmul.f32 %v633_v30, %v1110_v3 }
 0x208   :  { %v1171_v33 = vadd.f32 %v236_v27, %v225_v31  ;;  %v1173_v34 = vadd.f32 %v236_v27, %v226_v32 }
 0x20a   :  { %v261_v35 = vmin.f32 %v1171_v33, 20.0  ;;  %v262_v38 = vmin.f32 %v1173_v34, 20.0  ;;  %vm429_vm2 = vcmp.gt.f32.partialorder %v1171_v33, 20.0  ;;  %vm430_vm3 = vcmp.gt.f32.partialorder %v1173_v34, 20.0 }
 0x20c   :  { %v269_v39 = vmul.f32 1.442695, %v261_v35  ;;  %v271_v40 = vmul.f32 1.442695, %v262_v38 }
 0x20e   :  { %928 = vpow2.f32 %v269_v39  ;;  %v1177_v41 = vpop.permute.xlu2 %222 }
 0x20f   :  { %930 = vpow2.f32 %v271_v40 }
 0x214   :  { %v929_v42 = vpop.eup %928 }
 0x215   :  { %v931_v45 = vpop.eup %930  ;;  %v285_v46 = vadd.f32 2.0, %v929_v42  ;;  %v628_v36 = vpop.permute.xlu1 %627 }
 0x216   :  { %v286_v47 = vadd.f32 2.0, %v931_v45  ;;  %v1179_v37 = vpop.permute.xlu2 %642  ;;  %v645_v48 = vmul.f32 %v628_v36, %v1092_v52  ;;  %v646_v50 = vmul.f32 %v628_v36, %v1094_v53  ;;  %v218_v57 = vpop.permute.xlu0 %217  ;;  %v227_v52 = vmul.f32 %v213_v28, %v1084_v43 }
 0x217   :  { %v1183_v56 = vmul.f32 %v929_v42, %v285_v46  ;;  %v228_v53 = vmul.f32 %v213_v28, %v1086_v44  ;;  %v229_v51 = vmul.f32 %v218_v57, %v1096_v54  ;;  %v230_v63 = vmul.f32 %v218_v57, %v1098_v55 }
 0x218   :  { %v1185_v49 = vmul.f32 %v931_v45, %v286_v47  ;;  %v1187_v58 = vadd.f32 %v645_v48, %v236_v27  ;;  %v1192_v60 = vadd.f32 %v646_v50, %v236_v27  ;;  %v1276_v7 = vmul.f32 %v1179_v37, %v1132_v21 }
 0x219   :  { %v1190_v59 = vadd.f32 2.0, %v1183_v56  ;;  %v1284_v21 = vmul.f32 %v1179_v37, %v1134_v22 }
 0x21a   :  { %v1195_v61 = vadd.f32 2.0, %v1185_v49  ;;  %v661_v62 = vmin.f32 %v1187_v58, 20.0  ;;  %v662_v0 = vmin.f32 %v1192_v60, 20.0  ;;  %vm829_vm9 = vcmp.gt.f32.partialorder %v1187_v58, 20.0 }
 0x21b   :  { %932 = vrcp.f32 %v1190_v59  ;;  %v318_v10 = vand.u32 2147483647, %v1190_v59  ;;  %v320_v8 = vand.u32 2147483648, %v1190_v59  ;;  %vm314_vm10 = vweird.f32 %v1190_v59 }
 0x21c   :  { %934 = vrcp.f32 %v1195_v61  ;;  %v669_v1 = vmul.f32 1.442695, %v661_v62  ;;  %v671_v44 = vmul.f32 1.442695, %v662_v0  ;;  %vm328_vm11 = vweird.f32 %v1195_v61 }
 0x21d   :  { %v332_v16 = vand.u32 2147483647, %v1195_v61  ;;  %v334_v17 = vand.u32 2147483648, %v1195_v61  ;;  %vm1230_vm12 = vcmp.eq.f32.partialorder %v318_v10, 8.507059e+37  ;;  %v321_v25 = vor.u32 1.1754944e-38, %v320_v8 }
 0x21e   :  { %v1209_v43 = vpop.permute.xlu2 %245  ;;  %936 = vpow2.f32 %v669_v1  ;;  %v241_v12 = vpop.permute.xlu0 %240 }
 0x21f   :  { %v1212_v54 = vadd.f32 %v1209_v43, %v229_v51  ;;  %v1215_v55 = vadd.f32 %v1209_v43, %v230_v63  ;;  %v1218_v2 = vadd.f32 %v241_v12, %v227_v52  ;;  %v1220_v3 = vadd.f32 %v241_v12, %v228_v53 }
 0x220   :  { %v1222_v13 = vadd.f32 %v647_v6, %v241_v12  ;;  %938 = vpow2.f32 %v671_v44  ;;  %v1227_v18 = vadd.f32 %v648_v9, %v241_v12  ;;  %v335_v53 = vor.u32 1.1754944e-38, %v334_v17 }
 0x221   :  { %v933_v11 = vpop.eup %932  ;;  %v263_v23 = vmin.f32 %v1218_v2, 20.0  ;;  %v264_v24 = vmin.f32 %v1220_v3, 20.0  ;;  %v265_v27 = vmin.f32 %v1212_v54, 20.0  ;;  %v266_v28 = vmin.f32 %v1215_v55, 20.0 }
 0x222   :  { %v935_v19 = vpop.eup %934  ;;  %v310_v20 = vmul.f32 %v933_v11, %v1190_v59  ;;  %v663_v32 = vmin.f32 %v1222_v13, 20.0  ;;  %vm315_vm13 = vweird.f32 %v933_v11  ;;  %v664_v39 = vmin.f32 %v1227_v18, 20.0 }
 0x223   :  { %v324_v26 = vmul.f32 %v935_v19, %v1195_v61  ;;  %v273_v30 = vmul.f32 1.442695, %v263_v23  ;;  %v275_v31 = vmul.f32 1.442695, %v264_v24  ;;  %vm329_vm14 = vweird.f32 %v935_v19  ;;  %vm316_vm15 = vmor %vm314_vm10, %vm315_vm13 }
 0x224   :  { %v311_v29 = vsub.f32 1.0, %v310_v20  ;;  %v937_v35 = vpop.eup %936  ;;  %v673_v45 = vmul.f32 1.442695, %v663_v32  ;;  %v675_v47 = vmul.f32 1.442695, %v664_v39  ;;  %vm330_vm0 = vmor %vm328_vm11, %vm329_vm14  ;;  %vm333_vm1 = vcmp.eq.f32.partialorder %v332_v16, 8.507059e+37 }
 0x225   :  { %v325_v38 = vsub.f32 1.0, %v324_v26  ;;  %v685_v42 = vadd.f32 2.0, %v937_v35  ;;  %940 = vpow2.f32 %v273_v30  ;;  %v277_v48 = vmul.f32 1.442695, %v265_v27  ;;  %v638_v23 = vpop.permute.xlu1 %637 }
 0x226   :  { %v312_v40 = vmul.f32 %v933_v11, %v311_v29  ;;  %v939_v46 = vpop.eup %938  ;;  %942 = vpow2.f32 %v275_v31  ;;  %v279_v51 = vmul.f32 1.442695, %v266_v28  ;;  %v1266_v16 = vmul.f32 %v1177_v41, %v1112_v4 }
 0x227   :  { %v326_v36 = vmul.f32 %v935_v19, %v325_v38  ;;  %v686_v57 = vadd.f32 2.0, %v939_v46  ;;  %v1241_v62 = vmul.f32 %v937_v35, %v685_v42  ;;  %944 = vpow2.f32 %v673_v45 }
 0x228   :  { %v313_v50 = vadd.f32 %v933_v11, %v312_v40  ;;  %946 = vpow2.f32 %v675_v47  ;;  %v1290_v30 = vmul.f32 %v638_v23, %v1124_v14  ;;  %vm830_vm11 = vcmp.gt.f32.partialorder %v1192_v60, 20.0 }
 0x229   :  { %v327_v52 = vadd.f32 %v935_v19, %v326_v36  ;;  %v1249_v0 = vmul.f32 %v939_v46, %v686_v57  ;;  %v1252_v1 = vadd.f32 2.0, %v1241_v62  ;;  %948 = vpow2.f32 %v277_v48 }
 0x22a   :  { %v317_v63 = vsel %vm316_vm15, %v933_v11, %v313_v50 }
 0x22b   :  { %v322_v6 = vsel %vm1230_vm12, %v321_v25, %v317_v63  ;;  %v331_v59 = vsel %vm330_vm0, %v935_v19, %v327_v52  ;;  %v941_v9 = vpop.eup %940  ;;  %v1258_v44 = vadd.f32 2.0, %v1249_v0  ;;  %950 = vrcp.f32 %v1252_v1 }
 0x22c   :  { %v336_v10 = vsel %vm333_vm1, %v335_v53, %v331_v59  ;;  %v421_v8 = vmul.f32 %v322_v6, %v1183_v56  ;;  %v943_v61 = vpop.eup %942  ;;  %952 = vpow2.f32 %v279_v51  ;;  %v718_v4 = vand.u32 2147483647, %v1252_v1 }
 0x22d   :  { %v422_v12 = vmul.f32 %v336_v10, %v1185_v49  ;;  %v945_v11 = vpop.eup %944  ;;  %954 = vrcp.f32 %v1258_v44  ;;  %v1272_v49 = vmul.f32 %v1177_v41, %v1114_v5  ;;  %v720_v26 = vand.u32 2147483648, %v1252_v1 }
 0x22e   :  { %v437_v17 = vsel %vm429_vm2, 1.0, %v421_v8  ;;  %v947_v56 = vpop.eup %946  ;;  %v287_v27 = vadd.f32 2.0, %v941_v9  ;;  %v288_v28 = vadd.f32 2.0, %v943_v61  ;;  %v687_v29 = vadd.f32 2.0, %v945_v11 }
 0x22f   :  { %v438_v19 = vsel %vm430_vm3, 1.0, %v422_v12  ;;  %v445_v20 = vmul.f32 %v437_v17, %v1171_v33  ;;  %v949_v24 = vpop.eup %948  ;;  %v732_v33 = vand.u32 2147483647, %v1258_v44  ;;  %v688_v5 = vadd.f32 2.0, %v947_v56 }
 0x230   :  { %v446_v25 = vmul.f32 %v438_v19, %v1173_v34  ;;  %vm714_vm4 = vweird.f32 %v1252_v1  ;;  %v1287_v34 = vmul.f32 %v941_v9, %v287_v27  ;;  %vm728_vm5 = vweird.f32 %v1258_v44 }
 0x231   :  { %453 = vst [vmem:[#allocation2] sm:$0xff] %v445_v20  ;;  %v951_v41 = vpop.eup %950  ;;  %v1294_v35 = vmul.f32 %v943_v61, %v288_v28  ;;  %v289_v38 = vadd.f32 2.0, %v949_v24  ;;  %vm1296_vm6 = vcmp.eq.f32.partialorder %v718_v4, 8.507059e+37  ;;  %v721_v22 = vor.u32 1.1754944e-38, %v720_v26 }
 0x232   :  { %454 = vst [vmem:[#allocation2 + $0x8] sm:$0xff] %v446_v25  ;;  %v953_v31 = vpop.eup %952  ;;  %v710_v32 = vmul.f32 %v951_v41, %v1252_v1  ;;  %v1301_v37 = vadd.f32 2.0, %v1287_v34  ;;  %v1303_v42 = vmul.f32 %v945_v11, %v687_v29  ;;  %vm1306_vm7 = vcmp.eq.f32.partialorder %v732_v33, 8.507059e+37 }
 0x233   :  { %v955_v39 = vpop.eup %954  ;;  %v1311_v36 = vadd.f32 2.0, %v1294_v35  ;;  %v1313_v47 = vmul.f32 %v947_v56, %v688_v5  ;;  %vm715_vm8 = vweird.f32 %v951_v41  ;;  %v734_v48 = vand.u32 2147483648, %v1258_v44 }
 0x234   :  { %v711_v14 = vsub.f32 1.0, %v710_v32  ;;  %v724_v45 = vmul.f32 %v955_v39, %v1258_v44  ;;  %956 = vrcp.f32 %v1301_v37  ;;  %v290_v50 = vadd.f32 2.0, %v953_v31  ;;  %vm716_vm12 = vmor %vm714_vm4, %vm715_vm8 }
 0x235   :  { %958 = vrcp.f32 %v1311_v36  ;;  %v1319_v53 = vmul.f32 %v949_v24, %v289_v38  ;;  %vm729_vm10 = vweird.f32 %v955_v39  ;;  %v346_v51 = vand.u32 2147483647, %v1301_v37 }
 0x236   :  { %v712_v57 = vmul.f32 %v951_v41, %v711_v14  ;;  %v725_v52 = vsub.f32 1.0, %v724_v45  ;;  %v348_v63 = vand.u32 2147483648, %v1301_v37  ;;  %v362_v6 = vand.u32 2147483648, %v1311_v36  ;;  %vm730_vm14 = vmor %vm728_vm5, %vm729_vm10 }
 0x237   :  { %v1326_v10 = vadd.f32 2.0, %v1303_v42  ;;  %v1329_v8 = vadd.f32 2.0, %v1313_v47  ;;  %v735_v61 = vor.u32 1.1754944e-38, %v734_v48  ;;  %v360_v12 = vand.u32 2147483647, %v1311_v36 }
 0x238   :  { %v713_v59 = vadd.f32 %v951_v41, %v712_v57  ;;  %v726_v9 = vmul.f32 %v955_v39, %v725_v52  ;;  %v1335_v11 = vmul.f32 %v953_v31, %v290_v50  ;;  %v1338_v17 = vmul.f32 %v638_v23, %v1126_v15  ;;  %v251_v57 = vpop.permute.xlu1 %250 }
 0x239   :  { %vm342_vm13 = vweird.f32 %v1301_v37  ;;  %960 = vrcp.f32 %v1326_v10  ;;  %v349_v1 = vor.u32 1.1754944e-38, %v348_v63  ;;  %vm356_vm15 = vweird.f32 %v1311_v36 }
 0x23a   :  { %v717_v56 = vsel %vm716_vm12, %v951_v41, %v713_v59  ;;  %v727_v19 = vadd.f32 %v955_v39, %v726_v9  ;;  %v957_v20 = vpop.eup %956  ;;  %v363_v25 = vor.u32 1.1754944e-38, %v362_v6  ;;  %962 = vrcp.f32 %v1329_v8 }
 0x23b   :  { %v722_v24 = vsel %vm1296_vm6, %v721_v22, %v717_v56  ;;  %v959_v15 = vpop.eup %958  ;;  %v338_v26 = vmul.f32 %v957_v20, %v1301_v37  ;;  %vm1351_vm0 = vcmp.eq.f32.partialorder %v346_v51, 8.507059e+37  ;;  %v1356_v33 = vadd.f32 2.0, %v1319_v53 }
 0x23c   :  { %v731_v23 = vsel %vm730_vm14, %v955_v39, %v727_v19  ;;  %v821_v4 = vmul.f32 %v722_v24, %v1241_v62  ;;  %v352_v28 = vmul.f32 %v959_v15, %v1311_v36  ;;  %vm1361_vm1 = vcmp.eq.f32.partialorder %v360_v12, 8.507059e+37 }
 0x23d   :  { %v736_v44 = vsel %vm1306_vm7, %v735_v61, %v731_v23  ;;  %v746_v62 = vand.u32 2147483647, %v1326_v10  ;;  %v748_v5 = vand.u32 2147483648, %v1326_v10  ;;  %v339_v32 = vsub.f32 1.0, %v338_v26 }
 0x23e   :  { %v822_v41 = vmul.f32 %v736_v44, %v1249_v0  ;;  %v837_v31 = vsel %vm829_vm9, 1.0, %v821_v4  ;;  %v1371_v38 = vadd.f32 2.0, %v1335_v11  ;;  %vm343_vm2 = vweird.f32 %v957_v20 }
 0x23f   :  { %v845_v39 = vmul.f32 %v837_v31, %v1187_v58  ;;  %v353_v40 = vsub.f32 1.0, %v352_v28  ;;  %vm357_vm3 = vweird.f32 %v959_v15  ;;  %vm431_vm4 = vcmp.gt.f32.partialorder %v1218_v2, 20.0  ;;  %v961_v22 = vpop.eup %960  ;;  %vm344_vm9 = vmor %vm342_vm13, %vm343_vm2 }
 0x240   :  { %vm742_vm5 = vweird.f32 %v1326_v10  ;;  %v838_v0 = vsel %vm830_vm11, 1.0, %v822_v41  ;;  %v340_v14 = vmul.f32 %v957_v20, %v339_v32  ;;  %vm432_vm6 = vcmp.gt.f32.partialorder %v1220_v3, 20.0  ;;  %v963_v46 = vpop.eup %962  ;;  %vm358_vm12 = vmor %vm356_vm15, %vm357_vm3 }
 0x241   :  { %v760_v45 = vand.u32 2147483647, %v1329_v8  ;;  %964 = vrcp.f32 %v1356_v33  ;;  %v846_v58 = vmul.f32 %v838_v0, %v1192_v60  ;;  %854 = vst [vmem:[#allocation2 + $0x40] sm:$0xff] %v845_v39  ;;  %v354_v48 = vmul.f32 %v959_v15, %v353_v40 }
 0x242   :  { %v738_v50 = vmul.f32 %v961_v22, %v1326_v10  ;;  %vm1383_vm7 = vcmp.eq.f32.partialorder %v746_v62, 8.507059e+37  ;;  %v749_v52 = vor.u32 1.1754944e-38, %v748_v5  ;;  %v341_v51 = vadd.f32 %v957_v20, %v340_v14 }
 0x243   :  { %v752_v63 = vmul.f32 %v963_v46, %v1329_v8  ;;  %v762_v6 = vand.u32 2147483648, %v1329_v8  ;;  %855 = vst [vmem:[#allocation2 + $0x48] sm:$0xff] %v846_v58  ;;  %v355_v60 = vadd.f32 %v959_v15, %v354_v48  ;;  %vm743_vm10 = vweird.f32 %v961_v22 }
 0x244   :  { %v739_v59 = vsub.f32 1.0, %v738_v50  ;;  %vm757_vm11 = vweird.f32 %v963_v46  ;;  %v345_v9 = vsel %vm344_vm9, %v957_v20, %v341_v51  ;;  %vm1396_vm14 = vcmp.eq.f32.partialorder %v760_v45, 8.507059e+37  ;;  %vm744_vm15 = vmor %vm742_vm5, %vm743_vm10 }
 0x245   :  { %v753_v61 = vsub.f32 1.0, %v752_v63  ;;  %vm831_vm8 = vcmp.gt.f32.partialorder %v1222_v13, 20.0  ;;  %v374_v56 = vand.u32 2147483647, %v1356_v33  ;;  %v350_v37 = vsel %vm1351_vm0, %v349_v1, %v345_v9 }
 0x246   :  { %v359_v19 = vsel %vm358_vm12, %v959_v15, %v355_v60  ;;  %v740_v24 = vmul.f32 %v961_v22, %v739_v59  ;;  %vm832_vm13 = vcmp.gt.f32.partialorder %v1227_v18, 20.0  ;;  %966 = vrcp.f32 %v1371_v38 }
 0x247   :  { %v965_v36 = vpop.eup %964  ;;  %v364_v20 = vsel %vm1361_vm1, %v363_v25, %v359_v19  ;;  %v423_v23 = vmul.f32 %v350_v37, %v1287_v34  ;;  %v754_v4 = vmul.f32 %v963_v46, %v753_v61  ;;  %v763_v26 = vor.u32 1.1754944e-38, %v762_v6 }
 0x248   :  { %v424_v44 = vmul.f32 %v364_v20, %v1294_v35  ;;  %v741_v28 = vadd.f32 %v961_v22, %v740_v24  ;;  %v366_v27 = vmul.f32 %v965_v36, %v1356_v33  ;;  %v376_v1 = vand.u32 2147483648, %v1356_v33 }
 0x249   :  { %v439_v15 = vsel %vm431_vm4, 1.0, %v423_v23  ;;  %v755_v29 = vadd.f32 %v963_v46, %v754_v4  ;;  %vm370_vm0 = vweird.f32 %v1356_v33  ;;  %vm1418_vm1 = vcmp.eq.f32.partialorder %v374_v56, 8.507059e+37 }
 0x24a   :  { %v440_v35 = vsel %vm432_vm6, 1.0, %v424_v44  ;;  %v447_v25 = vmul.f32 %v439_v15, %v1218_v2  ;;  %v745_v62 = vsel %vm744_vm15, %v961_v22, %v741_v28  ;;  %vm1612_vm2 = vweird.f32 %v1329_v8 }
 0x24b   :  { %vm758_vm3 = vmor %vm1612_vm2, %vm757_vm11  ;;  %v367_v5 = vsub.f32 1.0, %v366_v27  ;;  %v448_v10 = vmul.f32 %v440_v35, %v1220_v3  ;;  %v750_v41 = vsel %vm1383_vm7, %v749_v52, %v745_v62  ;;  %vm371_vm4 = vweird.f32 %v965_v36 }
 0x24c   :  { %v759_v31 = vsel %vm758_vm3, %v963_v46, %v755_v29  ;;  %vm433_vm5 = vcmp.gt.f32.partialorder %v1212_v54, 20.0  ;;  %v967_v32 = vpop.eup %966  ;;  %455 = vst [vmem:[#allocation2 + $0x10] sm:$0xff] %v447_v25  ;;  %v823_v39 = vmul.f32 %v750_v41, %v1303_v42  ;;  %v377_v8 = vor.u32 1.1754944e-38, %v376_v1  ;;  %vm372_vm7 = vmor %vm370_vm0, %vm371_vm4 }
 0x24d   :  { %v764_v2 = vsel %vm1396_vm14, %v763_v26, %v759_v31  ;;  %v368_v40 = vmul.f32 %v965_v36, %v367_v5  ;;  %456 = vst [vmem:[#allocation2 + $0x18] sm:$0xff] %v448_v10  ;;  %v380_v3 = vmul.f32 %v967_v32, %v1371_v38  ;;  %vm384_vm6 = vweird.f32 %v1371_v38 }
 0x24e   :  { %v824_v22 = vmul.f32 %v764_v2, %v1313_v47  ;;  %v390_v0 = vand.u32 2147483648, %v1371_v38  ;;  %v839_v14 = vsel %vm831_vm8, 1.0, %v823_v39  ;;  %v388_v46 = vand.u32 2147483647, %v1371_v38 }
 0x24f   :  { %v369_v45 = vadd.f32 %v965_v36, %v368_v40  ;;  %v1444_v42 = vadd.f32 %v1290_v30, %v1209_v43  ;;  %v847_v47 = vmul.f32 %v839_v14, %v1222_v13  ;;  %v381_v48 = vsub.f32 1.0, %v380_v3 }
 0x250   :  { %v840_v58 = vsel %vm832_vm13, 1.0, %v824_v22  ;;  %v1454_v50 = vadd.f32 %v1338_v17, %v1209_v43  ;;  %vm385_vm8 = vweird.f32 %v967_v32  ;;  %v391_v6 = vor.u32 1.1754944e-38, %v390_v0 }
 0x251   :  { %v848_v52 = vmul.f32 %v840_v58, %v1227_v18  ;;  %v373_v51 = vsel %vm372_vm7, %v965_v36, %v369_v45  ;;  %v665_v30 = vmin.f32 %v1444_v42, 20.0  ;;  %856 = vst [vmem:[#allocation2 + $0x50] sm:$0xff] %v847_v47  ;;  %v382_v63 = vmul.f32 %v967_v32, %v381_v48  ;;  %vm386_vm9 = vmor %vm384_vm6, %vm385_vm8 }
 0x252   :  { %v378_v13 = vsel %vm1418_vm1, %v377_v8, %v373_v51  ;;  %v666_v33 = vmin.f32 %v1454_v50, 20.0  ;;  %v1463_v17 = vadd.f32 %v251_v57, %v1266_v16  ;;  %v1466_v18 = vadd.f32 %v251_v57, %v1272_v49 }
 0x253   :  { %857 = vst [vmem:[#allocation2 + $0x58] sm:$0xff] %v848_v52  ;;  %v425_v60 = vmul.f32 %v378_v13, %v1319_v53  ;;  %v677_v43 = vmul.f32 1.442695, %v665_v30  ;;  %v383_v59 = vadd.f32 %v967_v32, %v382_v63  ;;  %v1469_v61 = vadd.f32 %v1276_v7, %v251_v57 }
 0x254   :  { %v679_v9 = vmul.f32 1.442695, %v666_v33  ;;  %v1472_v12 = vadd.f32 %v1284_v21, %v251_v57  ;;  %v267_v16 = vmin.f32 %v1463_v17, 20.0  ;;  %v268_v49 = vmin.f32 %v1466_v18, 20.0 }
 0x255   :  { %v441_v53 = vsel %vm433_vm5, 1.0, %v425_v60  ;;  %968 = vpow2.f32 %v677_v43  ;;  %v387_v56 = vsel %vm386_vm9, %v967_v32, %v383_v59  ;;  %vm389_vm10 = vcmp.eq.f32.partialorder %v388_v46, 8.507059e+37 }
 0x256   :  { %v449_v7 = vmul.f32 %v441_v53, %v1212_v54  ;;  %970 = vpow2.f32 %v679_v9  ;;  %v392_v37 = vsel %vm389_vm10, %v391_v6, %v387_v56  ;;  %v281_v21 = vmul.f32 1.442695, %v267_v16 }
 0x257   :  { %v283_v19 = vmul.f32 1.442695, %v268_v49  ;;  %v426_v24 = vmul.f32 %v392_v37, %v1335_v11  ;;  %v667_v38 = vmin.f32 %v1469_v61, 20.0  ;;  %v668_v36 = vmin.f32 %v1472_v12, 20.0 }
 0x258   :  { %457 = vst [vmem:[#allocation2 + $0x20] sm:$0xff] %v449_v7  ;;  %vm434_vm11 = vcmp.gt.f32.partialorder %v1215_v55, 20.0  ;;  %972 = vpow2.f32 %v281_v21  ;;  %vm833_vm0 = vcmp.gt.f32.partialorder %v1444_v42, 20.0  ;;  %vm834_vm2 = vcmp.gt.f32.partialorder %v1454_v50, 20.0 }
 0x259   :  { %v442_v20 = vsel %vm434_vm11, 1.0, %v426_v24  ;;  %974 = vpow2.f32 %v283_v19  ;;  %v681_v23 = vmul.f32 1.442695, %v667_v38  ;;  %v683_v4 = vmul.f32 1.442695, %v668_v36 }
 0x25a   :  { %v450_v54 = vmul.f32 %v442_v20, %v1215_v55  ;;  %vm435_vm10 = vcmp.gt.f32.partialorder %v1463_v17, 20.0 }
 0x25b   :  { %v969_v26 = vpop.eup %968  ;;  %976 = vpow2.f32 %v681_v23 }
 0x25c   :  { %v971_v44 = vpop.eup %970  ;;  %v689_v28 = vadd.f32 2.0, %v969_v26  ;;  %458 = vst [vmem:[#allocation2 + $0x28] sm:$0xff] %v450_v54  ;;  %978 = vpow2.f32 %v683_v4 }
 0x25d   :  { %v690_v11 = vadd.f32 2.0, %v971_v44 }
 0x25e   :  { %v1487_v27 = vmul.f32 %v969_v26, %v689_v28  ;;  %v973_v1 = vpop.eup %972 }
 0x25f   :  { %v1489_v15 = vmul.f32 %v971_v44, %v690_v11  ;;  %v975_v29 = vpop.eup %974  ;;  %v291_v35 = vadd.f32 2.0, %v973_v1 }
 0x260   :  { %v705_v34 = vadd.f32 2.0, %v1487_v27  ;;  %v292_v62 = vadd.f32 2.0, %v975_v29 }
 0x261   :  { %v706_v25 = vadd.f32 2.0, %v1489_v15  ;;  %v977_v5 = vpop.eup %976  ;;  %v1493_v10 = vmul.f32 %v973_v1, %v291_v35 }
 0x262   :  { %980 = vrcp.f32 %v705_v34  ;;  %v979_v55 = vpop.eup %978  ;;  %v1495_v41 = vmul.f32 %v975_v29, %v292_v62  ;;  %v691_v31 = vadd.f32 2.0, %v977_v5  ;;  %v774_v40 = vand.u32 2147483647, %v705_v34 }
 0x263   :  { %982 = vrcp.f32 %v706_v25  ;;  %v692_v32 = vadd.f32 2.0, %v979_v55  ;;  %v1498_v2 = vadd.f32 2.0, %v1493_v10  ;;  %v776_v8 = vand.u32 2147483648, %v705_v34 }
 0x264   :  { %v1501_v39 = vadd.f32 2.0, %v1495_v41  ;;  %v1503_v22 = vmul.f32 %v977_v5, %v691_v31  ;;  %v788_v0 = vand.u32 2147483647, %v706_v25  ;;  %vm770_vm12 = vweird.f32 %v705_v34 }
 0x265   :  { %984 = vrcp.f32 %v1498_v2  ;;  %v1506_v14 = vmul.f32 %v979_v55, %v692_v32  ;;  %vm784_vm14 = vweird.f32 %v706_v25  ;;  %v790_v47 = vand.u32 2147483648, %v706_v25 }
 0x266   :  { %986 = vrcp.f32 %v1501_v39  ;;  %vm1509_vm13 = vcmp.eq.f32.partialorder %v774_v40, 8.507059e+37  ;;  %v777_v52 = vor.u32 1.1754944e-38, %v776_v8  ;;  %v1514_v51 = vadd.f32 2.0, %v1503_v22 }
 0x267   :  { %vm1516_vm15 = vcmp.eq.f32.partialorder %v788_v0, 8.507059e+37  ;;  %v402_v63 = vand.u32 2147483647, %v1498_v2  ;;  %v1523_v6 = vadd.f32 2.0, %v1506_v14  ;;  %v404_v60 = vand.u32 2147483648, %v1498_v2 }
 0x268   :  { %v981_v3 = vpop.eup %980  ;;  %988 = vrcp.f32 %v1514_v51  ;;  %v791_v9 = vor.u32 1.1754944e-38, %v790_v47  ;;  %v416_v53 = vand.u32 2147483647, %v1501_v39  ;;  %vm398_vm4 = vweird.f32 %v1498_v2 }
 0x269   :  { %v983_v45 = vpop.eup %982  ;;  %v766_v46 = vmul.f32 %v981_v3, %v705_v34  ;;  %vm771_vm1 = vweird.f32 %v981_v3  ;;  %990 = vrcp.f32 %v1523_v6  ;;  %vm1533_vm6 = vcmp.eq.f32.partialorder %v402_v63, 8.507059e+37 }
 0x26a   :  { %v780_v58 = vmul.f32 %v983_v45, %v706_v25  ;;  %vm785_vm3 = vweird.f32 %v983_v45  ;;  %vm772_vm5 = vmor %vm770_vm12, %vm771_vm1  ;;  %vm412_vm7 = vweird.f32 %v1501_v39  ;;  %v405_v38 = vor.u32 1.1754944e-38, %v404_v60 }
 0x26b   :  { %v767_v48 = vsub.f32 1.0, %v766_v46  ;;  %v985_v43 = vpop.eup %984  ;;  %vm786_vm8 = vmor %vm784_vm14, %vm785_vm3  ;;  %v418_v36 = vand.u32 2147483648, %v1501_v39  ;;  %vm1543_vm9 = vcmp.eq.f32.partialorder %v416_v53, 8.507059e+37  ;;  %vm436_vm12 = vcmp.gt.f32.partialorder %v1466_v18, 20.0 }
 0x26c   :  { %v781_v30 = vsub.f32 1.0, %v780_v58  ;;  %v987_v16 = vpop.eup %986  ;;  %v394_v56 = vmul.f32 %v985_v43, %v1498_v2  ;;  %vm399_vm11 = vweird.f32 %v985_v43  ;;  %v804_v55 = vand.u32 2147483648, %v1514_v51 }
 0x26d   :  { %v768_v33 = vmul.f32 %v981_v3, %v767_v48  ;;  %v408_v21 = vmul.f32 %v987_v16, %v1501_v39  ;;  %vm413_vm14 = vweird.f32 %v987_v16  ;;  %v419_v5 = vor.u32 1.1754944e-38, %v418_v36 }
 0x26e   :  { %v782_v59 = vmul.f32 %v983_v45, %v781_v30  ;;  %v395_v24 = vsub.f32 1.0, %v394_v56  ;;  %v989_v54 = vpop.eup %988  ;;  %vm798_vm1 = vweird.f32 %v1514_v51  ;;  %v805_v48 = vor.u32 1.1754944e-38, %v804_v55 }
 0x26f   :  { %v769_v49 = vadd.f32 %v981_v3, %v768_v33  ;;  %v409_v4 = vsub.f32 1.0, %v408_v21  ;;  %v794_v34 = vmul.f32 %v989_v54, %v1514_v51  ;;  %v991_v35 = vpop.eup %990  ;;  %v818_v57 = vand.u32 2147483648, %v1523_v6 }
 0x270   :  { %v783_v7 = vadd.f32 %v983_v45, %v782_v59  ;;  %v396_v11 = vmul.f32 %v985_v43, %v395_v24  ;;  %v808_v0 = vmul.f32 %v991_v35, %v1523_v6  ;;  %vm813_vm3 = vweird.f32 %v991_v35 }
 0x271   :  { %v773_v19 = vsel %vm772_vm5, %v981_v3, %v769_v49  ;;  %v410_v29 = vmul.f32 %v987_v16, %v409_v4  ;;  %v795_v32 = vsub.f32 1.0, %v794_v34  ;;  %v802_v3 = vand.u32 2147483647, %v1514_v51 }
 0x272   :  { %v778_v20 = vsel %vm1509_vm13, %v777_v52, %v773_v19  ;;  %v787_v23 = vsel %vm786_vm8, %v983_v45, %v783_v7  ;;  %v397_v62 = vadd.f32 %v985_v43, %v396_v11  ;;  %vm400_vm13 = vmor %vm398_vm4, %vm399_vm11  ;;  %v809_v39 = vsub.f32 1.0, %v808_v0 }
 0x273   :  { %v792_v44 = vsel %vm1516_vm15, %v791_v9, %v787_v23  ;;  %v825_v28 = vmul.f32 %v778_v20, %v1487_v27  ;;  %vm414_vm15 = vmor %vm412_vm7, %vm413_vm14  ;;  %v796_v46 = vmul.f32 %v989_v54, %v795_v32  ;;  %v816_v13 = vand.u32 2147483647, %v1523_v6 }
 0x274   :  { %v826_v1 = vmul.f32 %v792_v44, %v1489_v15  ;;  %v411_v15 = vadd.f32 %v987_v16, %v410_v29  ;;  %v401_v8 = vsel %vm400_vm13, %v985_v43, %v397_v62  ;;  %v810_v30 = vmul.f32 %v991_v35, %v809_v39 }
 0x275   :  { %v841_v25 = vsel %vm833_vm0, 1.0, %v825_v28  ;;  %v406_v45 = vsel %vm1533_vm6, %v405_v38, %v401_v8  ;;  %vm799_vm0 = vweird.f32 %v989_v54  ;;  %v797_v47 = vadd.f32 %v989_v54, %v796_v46 }
 0x276   :  { %v842_v27 = vsel %vm834_vm2, 1.0, %v826_v1  ;;  %v849_v31 = vmul.f32 %v841_v25, %v1444_v42  ;;  %v415_v42 = vsel %vm414_vm15, %v987_v16, %v411_v15  ;;  %vm800_vm2 = vmor %vm798_vm1, %vm799_vm0  ;;  %vm803_vm4 = vcmp.eq.f32.partialorder %v802_v3, 8.507059e+37 }
 0x277   :  { %v850_v40 = vmul.f32 %v842_v27, %v1454_v50  ;;  %v420_v2 = vsel %vm1543_vm9, %v419_v5, %v415_v42  ;;  %v427_v50 = vmul.f32 %v406_v45, %v1493_v10  ;;  %v801_v63 = vsel %vm800_vm2, %v989_v54, %v797_v47 }
 0x278   :  { %858 = vst [vmem:[#allocation2 + $0x60] sm:$0xff] %v849_v31  ;;  %v428_v58 = vmul.f32 %v420_v2, %v1495_v41  ;;  %v806_v33 = vsel %vm803_vm4, %v805_v48, %v801_v63  ;;  %v811_v60 = vadd.f32 %v991_v35, %v810_v30  ;;  %vm812_vm5 = vweird.f32 %v1523_v6 }
 0x279   :  { %859 = vst [vmem:[#allocation2 + $0x68] sm:$0xff] %v850_v40  ;;  %v443_v52 = vsel %vm435_vm10, 1.0, %v427_v50  ;;  %vm814_vm6 = vmor %vm812_vm5, %vm813_vm3  ;;  %v819_v43 = vor.u32 1.1754944e-38, %v818_v57  ;;  %v827_v59 = vmul.f32 %v806_v33, %v1503_v22  ;;  %vm817_vm7 = vcmp.eq.f32.partialorder %v816_v13, 8.507059e+37 }
 0x27a   :  { %v444_v10 = vsel %vm436_vm12, 1.0, %v428_v58  ;;  %v451_v51 = vmul.f32 %v443_v52, %v1463_v17  ;;  %v815_v9 = vsel %vm814_vm6, %v991_v35, %v811_v60  ;;  %vm835_vm8 = vcmp.gt.f32.partialorder %v1469_v61, 20.0 }
 0x27b   :  { %v452_v41 = vmul.f32 %v444_v10, %v1466_v18  ;;  %v820_v53 = vsel %vm817_vm7, %v819_v43, %v815_v9  ;;  %v843_v17 = vsel %vm835_vm8, 1.0, %v827_v59  ;;  %vm836_vm9 = vcmp.gt.f32.partialorder %v1472_v12, 20.0 }
 0x27c   :  { %459 = vst [vmem:[#allocation2 + $0x30] sm:$0xff] %v451_v51  ;;  %v828_v18 = vmul.f32 %v820_v53, %v1506_v14  ;;  %v851_v6 = vmul.f32 %v843_v17, %v1469_v61 }
 0x27d   :  { %460 = vst [vmem:[#allocation2 + $0x38] sm:$0xff] %v452_v41 }
 0x27e   :  { %v844_v22 = vsel %vm836_vm9, 1.0, %v828_v18  ;;  %860 = vst [vmem:[#allocation2 + $0x70] sm:$0xff] %v851_v6 }
 0x27f   :  { %v852_v16 = vmul.f32 %v844_v22, %v1472_v12 }
 0x281   :  { %861 = vst [vmem:[#allocation2 + $0x78] sm:$0xff] %v852_v16 }
 0x282   :  { %874 = dma.vmem_to_hbm [thread:$0]  %s867_s11, 2048, %s869_s14, [#allocation3], %s1020_s15, %s1020_s15, %s1021_s16  }
 0x283   :  { %1016 = dma.done.wait [#allocation3], 2048  }
 0x284   :  { %1017 = vsyncadd [#allocation3], 4294965248 }
 0x285   :  { %879 = vsyncpa [#allocation3], 1 }

</bundles_post_ra>
